<compile_context>
chip_gen: v7x
topology: tpu7x:2x2x1
jax: 0.10.0
libtpu: 0.0.40
codegen_flags: <defaults>
</compile_context>

<pallas_src>
import functools

import jax
import jax.numpy as jnp
from jax import lax
from jax.experimental import pallas as pl
from jax.experimental.pallas import tpu as pltpu

ALPHA = 0.25
GAMMA = 2.0
LANES = 128
MIN_ALIGN = 8 * LANES        # smallest legal (rows, 128) slab = one (8,128) tile
CHUNK_ROWS = 256             # rows per in-kernel sub-block (bounds VMEM temporaries)
MAX_TILE_ROWS = 4096         # 4096*128*4B = 2 MiB per f32 input tile (fits every generation)


def _num_tensorcores():
    """2 on v7x (two TensorCores per chip); 1 on v5e/v6e/unknown devices."""
    try:
        kind = jax.devices()[0].device_kind.lower()
    except Exception:
        return 1
    return 2 if "7" in kind else 1


def _focal_sums_kernel(logits_ref, targets_ref, loss_ref, fw_ref, *,
                       gamma, n_valid, n_tiles_inner, tile_rows, chunk_rows):
    """Accumulates per-core partial sums of (1-p_t)**gamma * bce and (1-p_t)**gamma.

    alpha is intentionally NOT applied here: both outputs are linear in alpha, so it is
    folded into the final scalar reduction in the wrapper (one fewer VPU mul / element).
    """
    c = pl.program_id(0)          # core-split index (CORE_PARALLEL on v7x, size 1 elsewhere)
    i = pl.program_id(1)          # tile index within this core's slice ("arbitrary")

    @pl.when(i == 0)
    def _():
        loss_ref[...] = jnp.zeros_like(loss_ref)
        fw_ref[...] = jnp.zeros_like(fw_ref)

    tile_elems = tile_rows * LANES
    start = (c * n_tiles_inner + i) * tile_elems     # global element offset of this tile
    n_chunks = tile_rows // chunk_rows

    def chunk(j, masked):
        r0 = pl.multiple_of(j * chunk_rows, chunk_rows)
        x = logits_ref[pl.ds(r0, chunk_rows), :].astype(jnp.float32)
        t = targets_ref[pl.ds(r0, chunk_rows), :].astype(jnp.float32)

        # Numerically stable BCE-with-logits (== F.binary_cross_entropy_with_logits).
        # log(1+e) with e in (0,1] is numerically fine here (log1p only matters for tiny e,
        # where the term is negligible anyway) and is guaranteed to lower on Mosaic.
        e = jnp.exp(-jnp.abs(x))
        bce = jnp.maximum(x, 0.0) - x * t + jnp.log(1.0 + e)

        # sigmoid via a single EUP tanh: no divide, no reciprocal + Newton refinement.
        p = 0.5 * jnp.tanh(0.5 * x) + 0.5
        # q = 1 - p_t, computed directly (saves ~3 VALU ops / element vs building p_t).
        q = p + t - 2.0 * p * t
        qg = q * q if float(gamma) == 2.0 else q ** gamma   # gamma=2 -> square, no pow

        loss = qg * bce
        fw = qg
        if masked:
            row = lax.broadcasted_iota(jnp.int32, (chunk_rows, LANES), 0)
            lane = lax.broadcasted_iota(jnp.int32, (chunk_rows, LANES), 1)
            idx = start + (r0 + row) * LANES + lane
            valid = idx < n_valid
            # select (not multiply) so garbage/NaN from OOB boundary reads cannot leak in.
            loss = jnp.where(valid, loss, 0.0)
            fw = jnp.where(valid, fw, 0.0)

        # Fold the (chunk_rows, 128) chunk into the vreg-shaped (8, 128) accumulators with
        # pure VPU adds (leading-axis sum; no cross-lane movement, no masked tiny stores).
        loss_ref[...] += jnp.sum(loss.reshape(-1, 8, LANES), axis=0)
        fw_ref[...] += jnp.sum(fw.reshape(-1, 8, LANES), axis=0)

    is_full = start + tile_elems <= n_valid

    @pl.when(is_full)
    def _():                      # hot path: no mask math; unrolled for LLO visibility
        def body(j, carry):
            chunk(j, masked=False)
            return carry
        lax.fori_loop(0, n_chunks, body, 0, unroll=True)

    @pl.when(jnp.logical_not(is_full))
    def _():                      # boundary / ghost tiles only (cold path, keep it compact)
        def body(j, carry):
            chunk(j, masked=True)
            return carry
        lax.fori_loop(0, n_chunks, body, 0, unroll=False)


def _focal_sums_pallas(x, t, gamma):
    """Partial sums of the (un-alpha'd) focal loss / weight over a flat, aligned slab."""
    n = x.shape[0]
    assert n % MIN_ALIGN == 0 and n > 0
    n_rows = n // LANES
    x2d = x.reshape(n_rows, LANES)        # lane-dense view of the flat slab (free reshape)
    t2d = t.reshape(n_rows, LANES)

    if n_rows <= CHUNK_ROWS:
        chunk_rows = tile_rows = n_rows   # single small tile (n_rows is a multiple of 8)
    else:
        chunk_rows = CHUNK_ROWS
        tile_rows = min(MAX_TILE_ROWS, (n_rows // CHUNK_ROWS) * CHUNK_ROWS)

    n_tiles_total = pl.cdiv(n_rows, tile_rows)
    ncores = min(_num_tensorcores(), n_tiles_total)

    def run(ncores, leading_sem):
        n_tiles_inner = pl.cdiv(n_tiles_total, ncores)

        def in_index_map(c, i):
            # Clamp so fully out-of-range ("ghost") tiles of the core split re-read the last
            # real tile; their contribution is masked to zero inside the kernel.
            return (jnp.minimum(c * n_tiles_inner + i, n_tiles_total - 1), 0)

        in_spec = pl.BlockSpec((tile_rows, LANES), in_index_map)
        out_spec = pl.BlockSpec((8, LANES), lambda c, i: (c, 0))

        kernel = functools.partial(
            _focal_sums_kernel, gamma=float(gamma), n_valid=n,
            n_tiles_inner=n_tiles_inner, tile_rows=tile_rows, chunk_rows=chunk_rows)

        cost = pl.CostEstimate(
            flops=22 * n,
            transcendentals=3 * n,
            bytes_accessed=n * (x.dtype.itemsize + t.dtype.itemsize)
            + 2 * ncores * 8 * LANES * 4)

        return pl.pallas_call(
            kernel,
            out_shape=(jax.ShapeDtypeStruct((ncores * 8, LANES), jnp.float32),
                       jax.ShapeDtypeStruct((ncores * 8, LANES), jnp.float32)),
            grid_spec=pltpu.PrefetchScalarGridSpec(
                num_scalar_prefetch=0,
                grid=(ncores, n_tiles_inner),
                in_specs=[in_spec, in_spec],
                out_specs=(out_spec, out_spec)),
            compiler_params=pltpu.CompilerParams(
                dimension_semantics=(leading_sem, pltpu.ARBITRARY),
                vmem_limit_bytes=32 * 1024 * 1024),
            cost_estimate=cost,
        )(x2d, t2d)

    if ncores > 1:
        # v7x: shard the reduction across both TensorCores. CORE_PARALLEL is the semantics
        # documented to actually change codegen; fall back to the serial grid if rejected.
        try:
            return run(ncores, pltpu.CORE_PARALLEL)
        except Exception:
            pass
    return run(1, pltpu.ARBITRARY)


def focal_loss(logits, targets, alpha=ALPHA, gamma=GAMMA, reduction='mean'):
    """Sigmoid focal loss. Returns (reduced loss, mean focal weight) as f32 scalars.

    Caller contract: logits/targets may be f32 or bf16 (and integer 0/1 targets); they are
    streamed in their native dtype and upcast to f32 inside the kernel — do not pre-cast.
    """
    assert logits.shape == targets.shape
    n_valid = int(logits.size)
    assert n_valid > 0

    x_flat = logits.reshape(-1)
    t_flat = targets.reshape(-1)

    n_main = (n_valid // MIN_ALIGN) * MIN_ALIGN   # aligned prefix handled by the kernel

    loss_sum = jnp.zeros((), jnp.float32)
    fw_sum = jnp.zeros((), jnp.float32)

    if n_main > 0:
        # Aligned shapes are zero-copy; only ragged shapes pay for a prefix slice.
        x_main = x_flat if n_main == n_valid else x_flat[:n_main]
        t_main = t_flat if n_main == n_valid else t_flat[:n_main]
        loss_parts, fw_parts = _focal_sums_pallas(x_main, t_main, gamma)
        loss_sum = loss_sum + jnp.sum(loss_parts)
        fw_sum = fw_sum + jnp.sum(fw_parts)

    if n_main < n_valid:
        # <=1023-element ragged tail: plain jnp (negligible work), no full-array pad copy.
        xt = x_flat[n_main:].astype(jnp.float32)
        tt = t_flat[n_main:].astype(jnp.float32)
        e = jnp.exp(-jnp.abs(xt))
        bce = jnp.maximum(xt, 0.0) - xt * tt + jnp.log1p(e)
        p = jax.nn.sigmoid(xt)
        q = p + tt - 2.0 * p * tt
        qg = q * q if float(gamma) == 2.0 else q ** gamma
        loss_sum = loss_sum + jnp.sum(qg * bce)
        fw_sum = fw_sum + jnp.sum(qg)

    alpha = float(alpha)
    fw_mean = alpha * fw_sum / float(n_valid)     # == focal_weight.mean()
    total = alpha * loss_sum
    if reduction == 'mean':
        return total / float(n_valid), fw_mean
    elif reduction == 'sum':
        return total, fw_mean
    else:
        # TODO(synk): reduction='none' (per-element loss output) would need an
        # elementwise-output kernel variant; not implemented here.
        raise NotImplementedError("reduction='none' not supported by this kernel")


def _focal_loss_ref(logits, targets, alpha=ALPHA, gamma=GAMMA):
    x = logits.astype(jnp.float32)
    t = targets.astype(jnp.float32)
    bce = jnp.maximum(x, 0.0) - x * t + jnp.log1p(jnp.exp(-jnp.abs(x)))
    p = jax.nn.sigmoid(x)
    p_t = p * t + (1.0 - p) * (1.0 - t)
    fw = alpha * (1.0 - p_t) ** gamma
    return jnp.mean(fw * bce), jnp.mean(fw)


if __name__ == "__main__":
    key = jax.random.PRNGKey(0)

    def check(shape, k):
        k1, k2 = jax.random.split(k)
        logits = jax.random.normal(k1, shape, dtype=jnp.float32) * 2.0
        targets = (jax.random.uniform(k2, shape) > 0.5).astype(jnp.float32)
        loss, fw_mean = focal_loss(logits, targets)
        loss = jax.block_until_ready(loss)
        fw_mean = jax.block_until_ready(fw_mean)
        ref_loss, ref_fw = _focal_loss_ref(logits, targets)
        # rtol 1e-4: hardware tanh-based sigmoid + blockwise f32 accumulation order differ
        # slightly from the single jnp.mean reference; far below any formula-level error.
        assert jnp.allclose(loss, ref_loss, rtol=1e-4, atol=1e-6), (shape, loss, ref_loss)
        assert jnp.allclose(fw_mean, ref_fw, rtol=1e-4, atol=1e-6), (shape, fw_mean, ref_fw)

    ks = jax.random.split(key, 4)
    # Primary small NCHW case (per-pixel binary classification).
    check((2, 4, 16, 16), ks[0])
    # Ragged element count: aligned-prefix kernel + jnp tail (no pad copy).
    check((3, 5, 17, 19), ks[1])
    # Partial boundary tile: exercises in-kernel iota masking of OOB boundary reads.
    check((2, 4, 33, 128), ks[2])
    # Multi-tile case: tile loop / core split (on v7x) + masked last tile.
    check((2, 16, 160, 200), ks[3])

    print("KERNEL_OK")
</pallas_src>

<mosaic_0001>
module attributes {stable_mosaic.version = 11 : i64} {
  func.func @_focal_sums_kernel(%arg0: i32, %arg1: i32, %arg2: memref<16x128xf32, #tpu.memory_space<vmem>>, %arg3: memref<16x128xf32, #tpu.memory_space<vmem>>, %arg4: memref<8x128xf32, #tpu.memory_space<vmem>>, %arg5: memref<8x128xf32, #tpu.memory_space<vmem>>) attributes {dimension_semantics = [#tpu.dimension_semantics<arbitrary>, #tpu.dimension_semantics<arbitrary>], iteration_bounds = array<i64: 1, 1>, scalar_prefetch = 0 : i64, scratch_operands = 0 : i64, tpu.core_type = #tpu.core_type<tc>, window_params = [{transform_indices = @transform_0, window_bounds = array<i64: 16, 128>}, {transform_indices = @transform_1, window_bounds = array<i64: 16, 128>}, {transform_indices = @transform_2, window_bounds = array<i64: 8, 128>}, {transform_indices = @transform_3, window_bounds = array<i64: 8, 128>}]} {
    %c0_i32 = arith.constant 0 : i32
    %0 = arith.cmpi eq, %arg1, %c0_i32 : i32
    %1 = arith.extui %0 : i1 to i32
    %c0_i32_0 = arith.constant 0 : i32
    %2 = arith.cmpi ne, %1, %c0_i32_0 : i32
    scf.if %2 {
      %cst = arith.constant 0.000000e+00 : f32
      %13 = vector.broadcast %cst : f32 to vector<8x128xf32>
      %c0 = arith.constant 0 : index
      %c0_5 = arith.constant 0 : index
      %14 = vector.load %arg4[%c0, %c0_5] : memref<8x128xf32, #tpu.memory_space<vmem>>, vector<8x128xf32>
      tpu.vector_store %arg4[%c0, %c0_5], %13 {strides = array<i32>} : memref<8x128xf32, #tpu.memory_space<vmem>>, vector<8x128xf32>,
      %cst_6 = arith.constant 0.000000e+00 : f32
      %15 = vector.broadcast %cst_6 : f32 to vector<8x128xf32>
      %c0_7 = arith.constant 0 : index
      %c0_8 = arith.constant 0 : index
      %16 = vector.load %arg5[%c0_7, %c0_8] : memref<8x128xf32, #tpu.memory_space<vmem>>, vector<8x128xf32>
      tpu.vector_store %arg5[%c0_7, %c0_8], %15 {strides = array<i32>} : memref<8x128xf32, #tpu.memory_space<vmem>>, vector<8x128xf32>,
    } else {
    }
    %c1_i32 = arith.constant 1 : i32
    %3 = arith.muli %arg0, %c1_i32 : i32
    %4 = arith.addi %3, %arg1 : i32
    %c2048_i32 = arith.constant 2048 : i32
    %5 = arith.muli %4, %c2048_i32 : i32
    %c2048_i32_1 = arith.constant 2048 : i32
    %6 = arith.addi %5, %c2048_i32_1 : i32
    %c2048_i32_2 = arith.constant 2048 : i32
    %7 = arith.cmpi sle, %6, %c2048_i32_2 : i32
    %8 = arith.extui %7 : i1 to i32
    %c0_i32_3 = arith.constant 0 : i32
    %9 = arith.cmpi ne, %8, %c0_i32_3 : i32
    scf.if %9 {
      %c0_i32_5 = arith.constant 0 : i32
      %c16_i32 = arith.constant 16 : i32
      %13 = arith.muli %c0_i32_5, %c16_i32 : i32
      %14 = tpu.assume_multiple %13, 16 : i32
      %15 = arith.index_cast %14 : i32 to index
      %c0 = arith.constant 0 : index
      %16 = vector.load %arg2[%15, %c0] : memref<16x128xf32, #tpu.memory_space<vmem>>, vector<16x128xf32>
      %17 = arith.index_cast %14 : i32 to index
      %c0_6 = arith.constant 0 : index
      %18 = vector.load %arg3[%17, %c0_6] : memref<16x128xf32, #tpu.memory_space<vmem>>, vector<16x128xf32>
      %19 = math.absf %16 : vector<16x128xf32>
      %cst = arith.constant 0.000000e+00 : f32
      %20 = vector.broadcast %cst : f32 to vector<16x128xf32>
      %21 = arith.subf %20, %19 : vector<16x128xf32>
      %22 = math.exp %21 : vector<16x128xf32>
      %cst_7 = arith.constant 0.000000e+00 : f32
      %23 = vector.broadcast %cst_7 : f32 to vector<16x128xf32>
      %24 = arith.maximumf %16, %23 : vector<16x128xf32>
      %25 = arith.mulf %16, %18 : vector<16x128xf32>
      %26 = arith.subf %24, %25 : vector<16x128xf32>
      %cst_8 = arith.constant 1.000000e+00 : f32
      %27 = vector.broadcast %cst_8 : f32 to vector<16x128xf32>
      %28 = arith.addf %27, %22 : vector<16x128xf32>
      %29 = math.log %28 : vector<16x128xf32>
      %30 = arith.addf %26, %29 : vector<16x128xf32>
      %cst_9 = arith.constant 5.000000e-01 : f32
      %31 = vector.broadcast %cst_9 : f32 to vector<16x128xf32>
      %32 = arith.mulf %31, %16 : vector<16x128xf32>
      %33 = math.tanh %32 : vector<16x128xf32>
      %cst_10 = arith.constant 5.000000e-01 : f32
      %34 = vector.broadcast %cst_10 : f32 to vector<16x128xf32>
      %35 = arith.mulf %34, %33 : vector<16x128xf32>
      %cst_11 = arith.constant 5.000000e-01 : f32
      %36 = vector.broadcast %cst_11 : f32 to vector<16x128xf32>
      %37 = arith.addf %35, %36 : vector<16x128xf32>
      %38 = arith.addf %37, %18 : vector<16x128xf32>
      %cst_12 = arith.constant 2.000000e+00 : f32
      %39 = vector.broadcast %cst_12 : f32 to vector<16x128xf32>
      %40 = arith.mulf %39, %37 : vector<16x128xf32>
      %41 = arith.mulf %40, %18 : vector<16x128xf32>
      %42 = arith.subf %38, %41 : vector<16x128xf32>
      %43 = arith.mulf %42, %42 : vector<16x128xf32>
      %44 = arith.mulf %43, %30 : vector<16x128xf32>
      %c0_13 = arith.constant 0 : index
      %c0_14 = arith.constant 0 : index
      %45 = vector.load %arg4[%c0_13, %c0_14] : memref<8x128xf32, #tpu.memory_space<vmem>>, vector<8x128xf32>
      %46 = vector.shape_cast %44 : vector<16x128xf32> to vector<2x8x128xf32>
      %cst_15 = arith.constant dense<0.000000e+00> : vector<8x128xf32>
      %47 = vector.multi_reduction <add>, %46, %cst_15 [0] : vector<2x8x128xf32> to vector<8x128xf32>
      %48 = arith.addf %45, %47 : vector<8x128xf32>
      %c0_16 = arith.constant 0 : index
      %c0_17 = arith.constant 0 : index
      %49 = vector.load %arg4[%c0_16, %c0_17] : memref<8x128xf32, #tpu.memory_space<vmem>>, vector<8x128xf32>
      tpu.vector_store %arg4[%c0_16, %c0_17], %48 {strides = array<i32>} : memref<8x128xf32, #tpu.memory_space<vmem>>, vector<8x128xf32>,
      %c0_18 = arith.constant 0 : index
      %c0_19 = arith.constant 0 : index
      %50 = vector.load %arg5[%c0_18, %c0_19] : memref<8x128xf32, #tpu.memory_space<vmem>>, vector<8x128xf32>
      %51 = vector.shape_cast %43 : vector<16x128xf32> to vector<2x8x128xf32>
      %cst_20 = arith.constant dense<0.000000e+00> : vector<8x128xf32>
      %52 = vector.multi_reduction <add>, %51, %cst_20 [0] : vector<2x8x128xf32> to vector<8x128xf32>
      %53 = arith.addf %50, %52 : vector<8x128xf32>
      %c0_21 = arith.constant 0 : index
      %c0_22 = arith.constant 0 : index
      %54 = vector.load %arg5[%c0_21, %c0_22] : memref<8x128xf32, #tpu.memory_space<vmem>>, vector<8x128xf32>
      tpu.vector_store %arg5[%c0_21, %c0_22], %53 {strides = array<i32>} : memref<8x128xf32, #tpu.memory_space<vmem>>, vector<8x128xf32>,
      %c1_i32_23 = arith.constant 1 : i32
    } else {
    }
    %true = arith.constant true
    %10 = arith.xori %7, %true : i1
    %11 = arith.extui %10 : i1 to i32
    %c0_i32_4 = arith.constant 0 : i32
    %12 = arith.cmpi ne, %11, %c0_i32_4 : i32
    scf.if %12 {
      %c0_i32_5 = arith.constant 0 : i32
      %c16_i32 = arith.constant 16 : i32
      %13 = arith.muli %c0_i32_5, %c16_i32 : i32
      %14 = tpu.assume_multiple %13, 16 : i32
      %15 = arith.index_cast %14 : i32 to index
      %c0 = arith.constant 0 : index
      %16 = vector.load %arg2[%15, %c0] : memref<16x128xf32, #tpu.memory_space<vmem>>, vector<16x128xf32>
      %17 = arith.index_cast %14 : i32 to index
      %c0_6 = arith.constant 0 : index
      %18 = vector.load %arg3[%17, %c0_6] : memref<16x128xf32, #tpu.memory_space<vmem>>, vector<16x128xf32>
      %19 = math.absf %16 : vector<16x128xf32>
      %cst = arith.constant 0.000000e+00 : f32
      %20 = vector.broadcast %cst : f32 to vector<16x128xf32>
      %21 = arith.subf %20, %19 : vector<16x128xf32>
      %22 = math.exp %21 : vector<16x128xf32>
      %cst_7 = arith.constant 0.000000e+00 : f32
      %23 = vector.broadcast %cst_7 : f32 to vector<16x128xf32>
      %24 = arith.maximumf %16, %23 : vector<16x128xf32>
      %25 = arith.mulf %16, %18 : vector<16x128xf32>
      %26 = arith.subf %24, %25 : vector<16x128xf32>
      %cst_8 = arith.constant 1.000000e+00 : f32
      %27 = vector.broadcast %cst_8 : f32 to vector<16x128xf32>
      %28 = arith.addf %27, %22 : vector<16x128xf32>
      %29 = math.log %28 : vector<16x128xf32>
      %30 = arith.addf %26, %29 : vector<16x128xf32>
      %cst_9 = arith.constant 5.000000e-01 : f32
      %31 = vector.broadcast %cst_9 : f32 to vector<16x128xf32>
      %32 = arith.mulf %31, %16 : vector<16x128xf32>
      %33 = math.tanh %32 : vector<16x128xf32>
      %cst_10 = arith.constant 5.000000e-01 : f32
      %34 = vector.broadcast %cst_10 : f32 to vector<16x128xf32>
      %35 = arith.mulf %34, %33 : vector<16x128xf32>
      %cst_11 = arith.constant 5.000000e-01 : f32
      %36 = vector.broadcast %cst_11 : f32 to vector<16x128xf32>
      %37 = arith.addf %35, %36 : vector<16x128xf32>
      %38 = arith.addf %37, %18 : vector<16x128xf32>
      %cst_12 = arith.constant 2.000000e+00 : f32
      %39 = vector.broadcast %cst_12 : f32 to vector<16x128xf32>
      %40 = arith.mulf %39, %37 : vector<16x128xf32>
      %41 = arith.mulf %40, %18 : vector<16x128xf32>
      %42 = arith.subf %38, %41 : vector<16x128xf32>
      %43 = arith.mulf %42, %42 : vector<16x128xf32>
      %44 = arith.mulf %43, %30 : vector<16x128xf32>
      %45 = tpu.iota {dimensions = array<i32: 0>} : vector<16x128xi32>
      %46 = tpu.iota {dimensions = array<i32: 1>} : vector<16x128xi32>
      %47 = vector.broadcast %14 : i32 to vector<16x128xi32>
      %48 = arith.addi %47, %45 : vector<16x128xi32>
      %c128_i32 = arith.constant 128 : i32
      %49 = vector.broadcast %c128_i32 : i32 to vector<16x128xi32>
      %50 = arith.muli %48, %49 : vector<16x128xi32>
      %51 = vector.broadcast %5 : i32 to vector<16x128xi32>
      %52 = arith.addi %51, %50 : vector<16x128xi32>
      %53 = arith.addi %52, %46 : vector<16x128xi32>
      %c2048_i32_13 = arith.constant 2048 : i32
      %54 = vector.broadcast %c2048_i32_13 : i32 to vector<16x128xi32>
      %55 = arith.cmpi slt, %53, %54 : vector<16x128xi32>
      %cst_14 = arith.constant 0.000000e+00 : f32
      %56 = vector.broadcast %cst_14 : f32 to vector<16x128xf32>
      %57 = arith.select %55, %44, %56 : vector<16x128xi1>, vector<16x128xf32>
      %cst_15 = arith.constant 0.000000e+00 : f32
      %58 = vector.broadcast %cst_15 : f32 to vector<16x128xf32>
      %59 = arith.select %55, %43, %58 : vector<16x128xi1>, vector<16x128xf32>
      %c0_16 = arith.constant 0 : index
      %c0_17 = arith.constant 0 : index
      %60 = vector.load %arg4[%c0_16, %c0_17] : memref<8x128xf32, #tpu.memory_space<vmem>>, vector<8x128xf32>
      %61 = vector.shape_cast %57 : vector<16x128xf32> to vector<2x8x128xf32>
      %cst_18 = arith.constant dense<0.000000e+00> : vector<8x128xf32>
      %62 = vector.multi_reduction <add>, %61, %cst_18 [0] : vector<2x8x128xf32> to vector<8x128xf32>
      %63 = arith.addf %60, %62 : vector<8x128xf32>
      %c0_19 = arith.constant 0 : index
      %c0_20 = arith.constant 0 : index
      %64 = vector.load %arg4[%c0_19, %c0_20] : memref<8x128xf32, #tpu.memory_space<vmem>>, vector<8x128xf32>
      tpu.vector_store %arg4[%c0_19, %c0_20], %63 {strides = array<i32>} : memref<8x128xf32, #tpu.memory_space<vmem>>, vector<8x128xf32>,
      %c0_21 = arith.constant 0 : index
      %c0_22 = arith.constant 0 : index
      %65 = vector.load %arg5[%c0_21, %c0_22] : memref<8x128xf32, #tpu.memory_space<vmem>>, vector<8x128xf32>
      %66 = vector.shape_cast %59 : vector<16x128xf32> to vector<2x8x128xf32>
      %cst_23 = arith.constant dense<0.000000e+00> : vector<8x128xf32>
      %67 = vector.multi_reduction <add>, %66, %cst_23 [0] : vector<2x8x128xf32> to vector<8x128xf32>
      %68 = arith.addf %65, %67 : vector<8x128xf32>
      %c0_24 = arith.constant 0 : index
      %c0_25 = arith.constant 0 : index
      %69 = vector.load %arg5[%c0_24, %c0_25] : memref<8x128xf32, #tpu.memory_space<vmem>>, vector<8x128xf32>
      tpu.vector_store %arg5[%c0_24, %c0_25], %68 {strides = array<i32>} : memref<8x128xf32, #tpu.memory_space<vmem>>, vector<8x128xf32>,
      %c1_i32_26 = arith.constant 1 : i32
    } else {
    }
    return
  }
  func.func @transform_0(%arg0: i32, %arg1: i32) -> (i32, i32) {
    %c1_i32 = arith.constant 1 : i32
    %0 = arith.muli %arg0, %c1_i32 : i32
    %1 = arith.addi %0, %arg1 : i32
    %c0_i32 = arith.constant 0 : i32
    %2 = arith.minsi %1, %c0_i32 : i32
    %c0_i32_0 = arith.constant 0 : i32
    %c0_i32_1 = arith.constant 0 : i32
    return %2, %c0_i32_0 : i32, i32
  }
  func.func @transform_1(%arg0: i32, %arg1: i32) -> (i32, i32) {
    %c1_i32 = arith.constant 1 : i32
    %0 = arith.muli %arg0, %c1_i32 : i32
    %1 = arith.addi %0, %arg1 : i32
    %c0_i32 = arith.constant 0 : i32
    %2 = arith.minsi %1, %c0_i32 : i32
    %c0_i32_0 = arith.constant 0 : i32
    %c0_i32_1 = arith.constant 0 : i32
    return %2, %c0_i32_0 : i32, i32
  }
  func.func @transform_2(%arg0: i32, %arg1: i32) -> (i32, i32) {
    %c0_i32 = arith.constant 0 : i32
    %c0_i32_0 = arith.constant 0 : i32
    return %arg0, %c0_i32 : i32, i32
  }
  func.func @transform_3(%arg0: i32, %arg1: i32) -> (i32, i32) {
    %c0_i32 = arith.constant 0 : i32
    %c0_i32_0 = arith.constant 0 : i32
    return %arg0, %c0_i32 : i32, i32
  }
}

</mosaic_0001>

<bundles_post_ra>
// kernel: tpu_custom_call.1
= control target key start
LH: loop header
LB: loop body
LE: loop exit
PB: predicated region body
PF: predicated region fallthrough
CT: control target
= control target key end

     0   :  { %9 = vsyncpa [#allocation3], 0  ;;  %s432_s0 = inlined_call_operand.hbm [shape: f32[16,128], index: 0, kind: input, shape index: {}]   ;;  %s433_s1 = inlined_call_operand.hbm [shape: f32[16,128], index: 1, kind: input, shape index: {}]   ;;  %s434_s2 = inlined_call_operand.hbm [shape: f32[8,128], index: 2, kind: output, shape index: {0}]   ;;  %s435_s3 = inlined_call_operand.hbm [shape: f32[8,128], index: 3, kind: output, shape index: {1}]  }
   0x1   :  { %10 = vsyncpa [#allocation6], 0 }
   0x2   :  { %11 = vsyncpa [#allocation4], 0 }
   0x3   :  { %12 = vsyncpa [#allocation9], 0  ;;  %s358_s12 = smov [#allocation2]   ;;  %s262_s16 = scalar_lea.hbm %s432_s0, 256 }
   0x4   :  { %s24_s13 = sshll.u32 %s358_s12, 4  ;;  %p263_p0 = scmp.ne.s32.totalorder %s432_s0, %s262_s16  ;;  %s25_s13 = int_to_ptr.vmem [resolvable:$true] %s24_s13 }
   0x5   :  { %p266_p1 = scmp.lt.u32.totalorder %s262_s16, %s432_s0 }
   0x7   :  { %p268_p2 = pnand %p266_p1, %p263_p0 }
   0x9   :  { %271 = shalt.err (!%p268_p2)
}
   0xa   :  { %s272_s21 = scalar_lea.vmem %s25_s13, 256  ;;  %p277_p4 = scmp.lt.s32.totalorder %s25_s13, %s25_s13 }
   0xb   :  { %p273_p3 = scmp.ne.s32.totalorder %s25_s13, %s272_s21  ;;  %p278_p5 = scmp.lt.s32.totalorder %s272_s21, %s272_s21 }
   0xd   :  { %p279_p6 = por %p278_p5, %p277_p4 }
   0xf   :  { %p280_p7 = pnand %p279_p6, %p273_p3 }
  0x11   :  { %283 = shalt.err (!%p280_p7)
}
  0x12   :  { %s359_s22 = smov 128   ;;  %s360_s23 = smov 8  }
  0x13   :  { %30 = dma.hbm_to_vmem [thread:$0]  %s432_s0, 256, %s25_s13, [#allocation3], %s359_s22, %s359_s22, %s360_s23  }
  0x14   :  { %s361_s26 = smov [#allocation5]   ;;  %s284_s30 = scalar_lea.hbm %s433_s1, 256 }
  0x15   :  { %s42_s27 = sshll.u32 %s361_s26, 4  ;;  %p285_p8 = scmp.ne.s32.totalorder %s433_s1, %s284_s30  ;;  %s43_s27 = int_to_ptr.vmem [resolvable:$true] %s42_s27 }
  0x16   :  { %p288_p9 = scmp.lt.u32.totalorder %s284_s30, %s433_s1 }
  0x18   :  { %p290_p10 = pnand %p288_p9, %p285_p8 }
  0x1a   :  { %293 = shalt.err (!%p290_p10)
}
  0x1b   :  { %s294_s8 = scalar_lea.vmem %s43_s27, 256  ;;  %p299_p12 = scmp.lt.s32.totalorder %s43_s27, %s43_s27 }
  0x1c   :  { %p295_p11 = scmp.ne.s32.totalorder %s43_s27, %s294_s8  ;;  %p300_p13 = scmp.lt.s32.totalorder %s294_s8, %s294_s8 }
  0x1e   :  { %p301_p0 = por %p300_p13, %p299_p12 }
  0x20   :  { %p302_p1 = pnand %p301_p0, %p295_p11 }
  0x22   :  { %305 = shalt.err (!%p302_p1)
}
  0x23   :  { %48 = dma.hbm_to_vmem [thread:$0]  %s433_s1, 256, %s43_s27, [#allocation6], %s359_s22, %s359_s22, %s360_s23  }
  0x24   :  { %350 = dma.done.wait [#allocation3], 256  }
  0x25   :  { %351 = vsyncadd [#allocation3], 4294967040 }
  0x26   :  { %352 = dma.done.wait [#allocation6], 256  }
  0x27   :  { %353 = vsyncadd [#allocation6], 4294967040  ;;  %v76_v0 = vld [vmem:[#allocation2] sm:$0xff]  ;;  %v77_v1 = vld [vmem:[#allocation2 + $0x8] sm:$0xff]  ;;  %s362_s1 = smov [#allocation8]  }
  0x28   :  { %v80_v2 = vand.u32 2147483647, %v76_v0  ;;  %v81_v3 = vand.u32 2147483647, %v77_v1  ;;  %v102_v4 = vmul.f32 0.5, %v76_v0  ;;  %v103_v5 = vmul.f32 0.5, %v77_v1 }
  0x29   :  { %v78_v13 = vld [vmem:[#allocation5] sm:$0xff]  ;;  %v79_v16 = vld [vmem:[#allocation5 + $0x8] sm:$0xff]  ;;  %v88_v30 = vmax.f32 %v76_v0, 0.0  ;;  %v89_v32 = vmax.f32 %v77_v1, 0.0  ;;  %s225_s10 = sshll.u32 %s362_s1, 4  ;;  %s226_s10 = int_to_ptr.vmem [resolvable:$true] %s225_s10 }
  0x2a   :  { %v82_v6 = vsub.f32 0.0, %v80_v2  ;;  %v83_v7 = vsub.f32 0.0, %v81_v3  ;;  %250 = vtanh.f32 %v102_v4  ;;  %v90_v31 = vmul.f32 %v78_v13, %v76_v0  ;;  %s306_s11 = scalar_lea.vmem %s226_s10, 128  ;;  %p311_p3 = scmp.lt.s32.totalorder %s226_s10, %s226_s10 }
  0x2b   :  { %252 = vtanh.f32 %v103_v5  ;;  %v91_v33 = vmul.f32 %v79_v16, %v77_v1  ;;  %p307_p2 = scmp.ne.s32.totalorder %s226_s10, %s306_s11  ;;  %p312_p4 = scmp.lt.s32.totalorder %s306_s11, %s306_s11 }
  0x2c   :  { %v84_v8 = vmul.f32 1.442695, %v82_v6  ;;  %v86_v9 = vmul.f32 1.442695, %v83_v7  ;;  %v92_v37 = vsub.f32 %v88_v30, %v90_v31 }
  0x2d   :  { %v93_v39 = vsub.f32 %v89_v32, %v91_v33  ;;  %p313_p5 = por %p312_p4, %p311_p3 }
  0x2e   :  { %254 = vpow2.f32 %v84_v8 }
  0x2f   :  { %256 = vpow2.f32 %v86_v9  ;;  %p314_p6 = pnand %p313_p5, %p307_p2 }
  0x34   :  { %v251_v10 = vpop.eup %250 }
  0x35   :  { %v253_v11 = vpop.eup %252  ;;  %v106_v12 = vmul.f32 0.5, %v251_v10 }
  0x36   :  { %v107_v14 = vmul.f32 0.5, %v253_v11 }
  0x37   :  { %v108_v17 = vadd.f32 0.5, %v106_v12 }
  0x38   :  { %v255_v15 = vpop.eup %254  ;;  %v109_v20 = vadd.f32 0.5, %v107_v14 }
  0x39   :  { %v257_v18 = vpop.eup %256  ;;  %v94_v19 = vadd.f32 1.0, %v255_v15  ;;  %v110_v22 = vadd.f32 %v108_v17, %v78_v13  ;;  %v112_v23 = vmul.f32 2.0, %v108_v17 }
  0x3a   :  { %v95_v21 = vadd.f32 1.0, %v257_v18  ;;  %v111_v24 = vadd.f32 %v109_v20, %v79_v16  ;;  %v113_v25 = vmul.f32 2.0, %v109_v20 }
  0x3b   :  { %258 = vlog2.f32 %v94_v19  ;;  %v114_v26 = vmul.f32 %v112_v23, %v78_v13 }
  0x3c   :  { %260 = vlog2.f32 %v95_v21  ;;  %v115_v27 = vmul.f32 %v113_v25, %v79_v16 }
  0x3d   :  { %v116_v28 = vsub.f32 %v110_v22, %v114_v26 }
  0x3e   :  { %v117_v29 = vsub.f32 %v111_v24, %v115_v27 }
  0x3f   :  { %v118_v34 = vmul.f32 %v116_v28, %v116_v28 }
  0x40   :  { %v119_v35 = vmul.f32 %v117_v29, %v117_v29 }
  0x42   :  { %v127_v36 = vadd.f32 %v119_v35, %v118_v34 }
  0x44   :  { %129 = vst [vmem:[#allocation8] sm:$0xff] %v127_v36 }
  0x45   :  { %v259_v38 = vpop.eup %258 }
  0x46   :  { %v261_v40 = vpop.eup %260  ;;  %v97_v41 = vmul.f32 0.6931472, %v259_v38 }
  0x47   :  { %v99_v42 = vmul.f32 0.6931472, %v261_v40 }
  0x48   :  { %v100_v43 = vadd.f32 %v97_v41, %v92_v37 }
  0x49   :  { %317 = shalt.err (!%p314_p6)
}
  0x4a   :  { %s318_s14 = scalar_lea.hbm %s435_s3, 128 }
  0x4b   :  { %p319_p7 = scmp.ne.s32.totalorder %s435_s3, %s318_s14  ;;  %p322_p8 = scmp.lt.u32.totalorder %s318_s14, %s435_s3 }
  0x4d   :  { %p324_p9 = pnand %p322_p8, %p319_p7 }
  0x4f   :  { %327 = shalt.err (!%p324_p9)
}
  0x50   :  { %228 = dma.vmem_to_hbm [thread:$0]  %s226_s10, 128, %s435_s3, [#allocation9]   ;;  %v101_v44 = vadd.f32 %v99_v42, %v93_v39  ;;  %v120_v45 = vmul.f32 %v118_v34, %v100_v43 }
  0x51   :  { %s363_s21 = smov [#allocation7]  }
  0x52   :  { %v121_v46 = vmul.f32 %v119_v35, %v101_v44  ;;  %s215_s22 = sshll.u32 %s363_s21, 4  ;;  %s216_s22 = int_to_ptr.vmem [resolvable:$true] %s215_s22 }
  0x53   :  { %s328_s23 = scalar_lea.vmem %s216_s22, 128  ;;  %p333_p11 = scmp.lt.s32.totalorder %s216_s22, %s216_s22 }
  0x54   :  { %v123_v47 = vadd.f32 %v121_v46, %v120_v45  ;;  %p329_p10 = scmp.ne.s32.totalorder %s216_s22, %s328_s23  ;;  %p334_p12 = scmp.lt.s32.totalorder %s328_s23, %s328_s23 }
  0x56   :  { %125 = vst [vmem:[#allocation7] sm:$0xff] %v123_v47  ;;  %p335_p13 = por %p334_p12, %p333_p11 }
  0x58   :  { %p336_p0 = pnand %p335_p13, %p329_p10 }
  0x5a   :  { %339 = shalt.err (!%p336_p0)
}
  0x5b   :  { %s340_s26 = scalar_lea.hbm %s434_s2, 128 }
  0x5c   :  { %p341_p1 = scmp.ne.s32.totalorder %s434_s2, %s340_s26  ;;  %p344_p2 = scmp.lt.u32.totalorder %s340_s26, %s434_s2 }
  0x5e   :  { %p346_p3 = pnand %p344_p2, %p341_p1 }
  0x60   :  { %349 = shalt.err (!%p346_p3)
}
  0x61   :  { %218 = dma.vmem_to_hbm [thread:$0]  %s216_s22, 128, %s434_s2, [#allocation4]  }
  0x62   :  { %354 = dma.done.wait [#allocation4], 128  }
  0x63   :  { %355 = vsyncadd [#allocation4], 4294967168 }
  0x64   :  { %356 = dma.done.wait [#allocation9], 128  }
  0x65   :  { %357 = vsyncadd [#allocation9], 4294967168 }
  0x66   :  { %235 = vsyncpa [#allocation3], 1 }
  0x67   :  { %236 = vsyncpa [#allocation6], 1 }
  0x68   :  { %237 = vsyncpa [#allocation4], 1 }
  0x69   :  { %238 = vsyncpa [#allocation9], 1 }

</bundles_post_ra>
